<compile_context>
chip_gen: v5e
topology: v5e:2x2
jax: 0.10.0
libtpu: 0.0.40
codegen_flags: <defaults>
</compile_context>

<pallas_src>
import functools

import jax
import jax.numpy as jnp
from jax.experimental import pallas as pl
from jax.experimental.pallas import tpu as pltpu

_LANE = 128
_SUBLANE = 8

# Resolved lazily on the first forward: does this runtime accept
# BlockSpec(pipeline_mode=pl.Buffered(1)) for single-buffered weights?
_SINGLE_BUFFER_WEIGHTS_OK = None


def _round_up(n, m):
    return ((n + m - 1) // m) * m


def _vmem_capacity_bytes():
    """Physical VMEM per TensorCore (v5e/v6e: 128 MiB, v7x: 64 MiB)."""
    try:
        cap = int(pltpu.get_tpu_info().vmem_capacity_bytes)
        if cap > 0:
            return cap
    except Exception:
        pass
    return 64 * 1024 * 1024  # conservative fallback, safe on every generation


def _vmem_estimate(tile_b, d, io_itemsize, w_itemsize, weight_buffers):
    """Rough resident-VMEM estimate for one grid step."""
    io = 3 * 2 * tile_b * d * io_itemsize                  # x, y, out double-buffered
    weights = weight_buffers * 3 * d * d * w_itemsize      # [D,2D] + [D,D]
    params = 2 * (6 * d * 4)                               # LN params + biases
    live = 8 * tile_b * d * 4                              # f32 intermediates margin
    return io + weights + params + live


def _pick_tile_b(batch, d, io_itemsize, w_itemsize, capacity):
    """Largest batch tile (multiple of 8, <= 512) fitting ~80% of VMEM.

    Weights are assumed double-buffered here so the choice stays valid even if
    the Buffered(1) single-buffering path is unavailable at runtime.
    """
    budget = int(0.8 * capacity)
    b_cap = _round_up(max(batch, _SUBLANE), _SUBLANE)
    for cand in (512, 256, 128, 64, 32, 16, 8):
        t = min(cand, b_cap)
        if _vmem_estimate(t, d, io_itemsize, w_itemsize, 2) <= budget:
            return t
    return _SUBLANE


def _film_kernel(x_ref, y_ref, lnw_ref, lnb_ref,
                 wgb_ref, bgb_ref, wo_ref, bo_ref,
                 o_ref, *, eps, dim):
    """One batch-tile of the FiLM forward pass.

    x_ref, y_ref : (TB, D)   inputs (x conditions, y is modulated)
    lnw_ref/lnb_ref : (1, D) shared LayerNorm affine params
    wgb_ref : (D, 2D)        fused fc weight [gamma | beta], transposed [in, out]
    bgb_ref : (1, 2D)        fused fc bias
    wo_ref  : (D, D)         fc_out weight (transposed), bo_ref : (1, D) bias
    o_ref   : (TB, D)        output
    """
    lnw = lnw_ref[...]
    lnb = lnb_ref[...]

    def layer_norm(v):
        # Two-pass statistics (matches nn.LayerNorm; no cancellation issues).
        mu = jnp.mean(v, axis=-1, keepdims=True)
        d = v - mu
        var = jnp.mean(d * d, axis=-1, keepdims=True)
        return d * jax.lax.rsqrt(var + eps) * lnw + lnb

    # 1) Conditioning branch and the fused gamma|beta projection first ...
    film = layer_norm(x_ref[...].astype(jnp.float32))
    gb = jnp.dot(film.astype(wgb_ref.dtype), wgb_ref[...],
                 preferred_element_type=jnp.float32) + bgb_ref[...]

    # 2) ... then the modulated branch (smaller peak set of live intermediates).
    to_be_film = layer_norm(y_ref[...].astype(jnp.float32))

    gamma = gb[:, :dim]      # D % 128 == 0 -> lane-aligned, relayout-free split
    beta = gb[:, dim:]
    mid = gamma * to_be_film + beta

    out = jnp.dot(mid.astype(wo_ref.dtype), wo_ref[...],
                  preferred_element_type=jnp.float32) + bo_ref[...]
    o_ref[...] = out.astype(o_ref.dtype)


@functools.lru_cache(maxsize=None)
def _build_film_call(b_pad, d, tile_b, out_dtype_name, io_itemsize, w_itemsize,
                     eps, vmem_limit, single_buffer_weights):
    """Builds (and caches) the pallas_call for a given static configuration."""
    const_kw = {}
    if single_buffer_weights:
        # Grid-invariant blocks: one resident copy instead of two.
        const_kw = dict(pipeline_mode=pl.Buffered(1))

    io_spec = pl.BlockSpec((tile_b, d), lambda i: (i, 0))
    row_d = pl.BlockSpec((1, d), lambda i: (0, 0), **const_kw)
    row_2d = pl.BlockSpec((1, 2 * d), lambda i: (0, 0), **const_kw)
    wgb_spec = pl.BlockSpec((d, 2 * d), lambda i: (0, 0), **const_kw)
    wo_spec = pl.BlockSpec((d, d), lambda i: (0, 0), **const_kw)

    # Advisory cost model: 2 matmuls (D->2D and D->D) + ~2 rsqrt per row.
    cost = pl.CostEstimate(
        flops=6 * b_pad * d * d,
        transcendentals=2 * b_pad,
        bytes_accessed=3 * d * d * w_itemsize + 6 * d * 4
                       + 3 * b_pad * d * io_itemsize,
    )

    return pl.pallas_call(
        functools.partial(_film_kernel, eps=eps, dim=d),
        out_shape=jax.ShapeDtypeStruct((b_pad, d), jnp.dtype(out_dtype_name)),
        grid_spec=pltpu.PrefetchScalarGridSpec(
            num_scalar_prefetch=0,
            grid=(b_pad // tile_b,),
            in_specs=[io_spec, io_spec,     # x, y
                      row_d, row_d,         # LN weight, LN bias
                      wgb_spec, row_2d,     # fused fc weight [gamma|beta], bias
                      wo_spec, row_d],      # fc_out weight, bias
            out_specs=io_spec,
        ),
        compiler_params=pltpu.CompilerParams(
            dimension_semantics=("parallel",),
            vmem_limit_bytes=vmem_limit),
        cost_estimate=cost,
    )


def film_forward(x, y, params, *, eps=1e-6, tile_b=None, x_film=True):
    """FiLM forward: fc_out(gamma * LN(y) + beta), where [gamma|beta] = fc(LN(x)).

    x, y : [B, D] float arrays (f32 or bf16; output matches x.dtype).
    params : (lnw, lnb, wgb, bgb, wo, bo). wgb [D, 2D] and wo [D, D] are used in
        the dtype they are handed (bf16 recommended; f32 for exact parity).
    """
    B, D = x.shape
    assert y.shape == (B, D), "x and y must both be [B, D]"
    assert D % _LANE == 0, (
        "embedding_dim must be a multiple of 128 (lane width) so the fused "
        "gamma/beta split is lane-aligned")
    # TODO(synk): for D % 128 != 0, split into separate gamma / beta matmuls.
    if not x_film:
        x, y = y, x

    lnw, lnb, wgb, bgb, wo, bo = params
    io_itemsize = jnp.dtype(x.dtype).itemsize
    w_itemsize = jnp.dtype(wgb.dtype).itemsize

    capacity = _vmem_capacity_bytes()
    if tile_b is None:
        tile_b = _pick_tile_b(B, D, io_itemsize, w_itemsize, capacity)
    tile_b = min(_round_up(tile_b, _SUBLANE),
                 _round_up(max(B, _SUBLANE), _SUBLANE))

    # Pad awkward batches instead of collapsing to a single full-batch tile.
    b_pad = _round_up(B, tile_b)
    if b_pad != B:
        pad = ((0, b_pad - B), (0, 0))
        x = jnp.pad(x, pad)
        y = jnp.pad(y, pad)

    # Generation-aware VMEM budget (~85% of physical per-core capacity).
    budget = int(0.85 * capacity)
    vmem_est = _vmem_estimate(tile_b, D, io_itemsize, w_itemsize, 2)
    vmem_limit = int(min(max(2 * vmem_est, 32 * 1024 * 1024), budget))
    # TODO(synk): when resident weights (~6*D^2 bytes bf16) exceed the budget
    # (D >= ~2.5k on v7x), add an N-tiling grid axis so fc / fc_out weights
    # stream as (D, tn) blocks instead of residing whole.

    args = (x, y, lnw, lnb, wgb, bgb, wo, bo)
    out_dtype_name = jnp.dtype(x.dtype).name

    def run(single_buffer):
        call = _build_film_call(b_pad, D, tile_b, out_dtype_name, io_itemsize,
                                w_itemsize, float(eps), int(vmem_limit),
                                bool(single_buffer))
        return call(*args)

    global _SINGLE_BUFFER_WEIGHTS_OK
    if _SINGLE_BUFFER_WEIGHTS_OK is None:
        try:
            out = run(True)
            _SINGLE_BUFFER_WEIGHTS_OK = True
        except Exception:
            _SINGLE_BUFFER_WEIGHTS_OK = False
            out = run(False)
    else:
        out = run(_SINGLE_BUFFER_WEIGHTS_OK)

    return out[:B] if b_pad != B else out


def init_film_params(key, dim, *, weight_dtype=jnp.bfloat16):
    """Deterministic parameter init matching the PyTorch module.

    nn.Linear: xavier_normal_ weight (std = sqrt(2/(fan_in+fan_out))), bias = 0.
    nn.LayerNorm: weight = 1, bias = 0 (untouched by _init_weights).
    Matmul weights are stored pre-transposed to [in, out] and pre-cast to
    `weight_dtype` (bf16 default) so no per-forward cast / extra HBM pass.
    """
    k_fc, k_out = jax.random.split(key, 2)

    # fc: torch weight [2*dim, dim] -> transpose to [dim, 2*dim]; cols [:dim]=gamma.
    std_fc = (2.0 / (2 * dim + dim)) ** 0.5
    w_fc = jax.random.normal(k_fc, (2 * dim, dim), jnp.float32) * std_fc
    wgb = w_fc.T.astype(weight_dtype)
    bgb = jnp.zeros((1, 2 * dim), jnp.float32)

    # fc_out: torch weight [dim, dim] -> transpose to [in, out].
    std_out = (2.0 / (dim + dim)) ** 0.5
    w_out = jax.random.normal(k_out, (dim, dim), jnp.float32) * std_out
    wo = w_out.T.astype(weight_dtype)
    bo = jnp.zeros((1, dim), jnp.float32)

    lnw = jnp.ones((1, dim), jnp.float32)
    lnb = jnp.zeros((1, dim), jnp.float32)
    return (lnw, lnb, wgb, bgb, wo, bo)


def film_reference(x, y, params, eps=1e-6, x_film=True):
    """Plain-JAX (f32) reference matching the PyTorch module."""
    lnw, lnb, wgb, bgb, wo, bo = params
    wgb = wgb.astype(jnp.float32)
    wo = wo.astype(jnp.float32)
    if not x_film:
        x, y = y, x
    D = x.shape[-1]

    def ln(v):
        mu = jnp.mean(v, axis=-1, keepdims=True)
        var = jnp.mean((v - mu) ** 2, axis=-1, keepdims=True)
        return (v - mu) / jnp.sqrt(var + eps) * lnw + lnb

    film = ln(x)
    tbf = ln(y)
    gb = film @ wgb + bgb
    gamma, beta = gb[:, :D], gb[:, D:]
    out = gamma * tbf + beta
    return out @ wo + bo


if __name__ == "__main__":
    B = 16           # batch
    D = 128          # embedding_dim (args.embedding_dim)

    key = jax.random.PRNGKey(0)
    kx, ky, kp = jax.random.split(key, 3)
    x = jax.random.normal(kx, (B, D), jnp.float32)
    y = jax.random.normal(ky, (B, D), jnp.float32)
    params = init_film_params(kp, D)

    ref = film_reference(x, y, params)

    # Multi-step grid (exercises pipelining + single-buffered weight path).
    out = jax.block_until_ready(film_forward(x, y, params, tile_b=8))
    assert out.shape == (B, D)
    err = jnp.max(jnp.abs(out - ref))
    # bf16 matmul operands with f32 accumulation -> relaxed tolerance vs f32 ref.
    assert jnp.allclose(out, ref, atol=5e-2, rtol=5e-2), f"max abs err {err}"

    # Generation-aware default tile selection.
    out2 = jax.block_until_ready(film_forward(x, y, params))
    assert jnp.allclose(out2, ref, atol=5e-2, rtol=5e-2)

    # Batch not divisible by the tile -> zero-pad + slice path.
    out3 = jax.block_until_ready(film_forward(x[:12], y[:12], params, tile_b=8))
    assert out3.shape == (12, D)
    assert jnp.allclose(out3, ref[:12], atol=5e-2, rtol=5e-2)

    print("KERNEL_OK")
</pallas_src>

<mosaic_0001>
module attributes {stable_mosaic.version = 11 : i64} {
  func.func @_film_kernel(%arg0: i32, %arg1: memref<8x128xf32, #tpu.memory_space<vmem>>, %arg2: memref<8x128xf32, #tpu.memory_space<vmem>>, %arg3: memref<1x128xf32, #tpu.memory_space<vmem>>, %arg4: memref<1x128xf32, #tpu.memory_space<vmem>>, %arg5: memref<128x256xbf16, #tpu.memory_space<vmem>>, %arg6: memref<1x256xf32, #tpu.memory_space<vmem>>, %arg7: memref<128x128xbf16, #tpu.memory_space<vmem>>, %arg8: memref<1x128xf32, #tpu.memory_space<vmem>>, %arg9: memref<8x128xf32, #tpu.memory_space<vmem>>) attributes {dimension_semantics = [#tpu.dimension_semantics<parallel>], iteration_bounds = array<i64: 2>, scalar_prefetch = 0 : i64, scratch_operands = 0 : i64, tpu.core_type = #tpu.core_type<tc>, window_params = [{transform_indices = @transform_0, window_bounds = array<i64: 8, 128>}, {transform_indices = @transform_1, window_bounds = array<i64: 8, 128>}, {pipeline_mode = #tpu.pipeline_mode<synchronous>, transform_indices = @transform_2, window_bounds = array<i64: 1, 128>}, {pipeline_mode = #tpu.pipeline_mode<synchronous>, transform_indices = @transform_3, window_bounds = array<i64: 1, 128>}, {pipeline_mode = #tpu.pipeline_mode<synchronous>, transform_indices = @transform_4, window_bounds = array<i64: 128, 256>}, {pipeline_mode = #tpu.pipeline_mode<synchronous>, transform_indices = @transform_5, window_bounds = array<i64: 1, 256>}, {pipeline_mode = #tpu.pipeline_mode<synchronous>, transform_indices = @transform_6, window_bounds = array<i64: 128, 128>}, {pipeline_mode = #tpu.pipeline_mode<synchronous>, transform_indices = @transform_7, window_bounds = array<i64: 1, 128>}, {transform_indices = @transform_8, window_bounds = array<i64: 8, 128>}]} {
    %c0 = arith.constant 0 : index
    %c0_0 = arith.constant 0 : index
    %0 = vector.load %arg3[%c0, %c0_0] : memref<1x128xf32, #tpu.memory_space<vmem>>, vector<1x128xf32>
    %c0_1 = arith.constant 0 : index
    %c0_2 = arith.constant 0 : index
    %1 = vector.load %arg4[%c0_1, %c0_2] : memref<1x128xf32, #tpu.memory_space<vmem>>, vector<1x128xf32>
    %c0_3 = arith.constant 0 : index
    %c0_4 = arith.constant 0 : index
    %2 = vector.load %arg1[%c0_3, %c0_4] : memref<8x128xf32, #tpu.memory_space<vmem>>, vector<8x128xf32>
    %cst = arith.constant dense<0.000000e+00> : vector<8xf32>
    %3 = vector.multi_reduction <add>, %2, %cst [1] : vector<8x128xf32> to vector<8xf32>
    %4 = vector.shape_cast %3 : vector<8xf32> to vector<8x1xf32>
    %cst_5 = arith.constant 1.280000e+02 : f32
    %5 = vector.broadcast %cst_5 : f32 to vector<8x1xf32>
    %6 = arith.divf %4, %5 : vector<8x1xf32>
    %7 = vector.broadcast %6 : vector<8x1xf32> to vector<8x128xf32>
    %8 = arith.subf %2, %7 : vector<8x128xf32>
    %9 = arith.mulf %8, %8 : vector<8x128xf32>
    %cst_6 = arith.constant dense<0.000000e+00> : vector<8xf32>
    %10 = vector.multi_reduction <add>, %9, %cst_6 [1] : vector<8x128xf32> to vector<8xf32>
    %11 = vector.shape_cast %10 : vector<8xf32> to vector<8x1xf32>
    %cst_7 = arith.constant 1.280000e+02 : f32
    %12 = vector.broadcast %cst_7 : f32 to vector<8x1xf32>
    %13 = arith.divf %11, %12 : vector<8x1xf32>
    %cst_8 = arith.constant 9.99999997E-7 : f32
    %14 = vector.broadcast %cst_8 : f32 to vector<8x1xf32>
    %15 = arith.addf %13, %14 : vector<8x1xf32>
    %16 = math.rsqrt %15 : vector<8x1xf32>
    %17 = vector.broadcast %16 : vector<8x1xf32> to vector<8x128xf32>
    %18 = arith.mulf %8, %17 : vector<8x128xf32>
    %19 = vector.broadcast %0 : vector<1x128xf32> to vector<8x128xf32>
    %20 = arith.mulf %18, %19 : vector<8x128xf32>
    %21 = vector.broadcast %1 : vector<1x128xf32> to vector<8x128xf32>
    %22 = arith.addf %20, %21 : vector<8x128xf32>
    %23 = arith.truncf %22 : vector<8x128xf32> to vector<8x128xbf16>
    %c0_9 = arith.constant 0 : index
    %c0_10 = arith.constant 0 : index
    %24 = vector.load %arg5[%c0_9, %c0_10] : memref<128x256xbf16, #tpu.memory_space<vmem>>, vector<128x256xbf16>
    %cst_11 = arith.constant dense<0.000000e+00> : vector<8x256xf32>
    %25 = tpu.matmul %23, %24, %cst_11 {dimension_numbers = #tpu.dot_dimension_numbers<[1], [0], [0], [1], [0, 0, 1, 1], [], []>} : vector<8x128xbf16>, vector<128x256xbf16>, vector<8x256xf32> -> vector<8x256xf32>
    %c0_12 = arith.constant 0 : index
    %c0_13 = arith.constant 0 : index
    %26 = vector.load %arg6[%c0_12, %c0_13] : memref<1x256xf32, #tpu.memory_space<vmem>>, vector<1x256xf32>
    %27 = vector.broadcast %26 : vector<1x256xf32> to vector<8x256xf32>
    %28 = arith.addf %25, %27 : vector<8x256xf32>
    %c0_14 = arith.constant 0 : index
    %c0_15 = arith.constant 0 : index
    %29 = vector.load %arg2[%c0_14, %c0_15] : memref<8x128xf32, #tpu.memory_space<vmem>>, vector<8x128xf32>
    %cst_16 = arith.constant dense<0.000000e+00> : vector<8xf32>
    %30 = vector.multi_reduction <add>, %29, %cst_16 [1] : vector<8x128xf32> to vector<8xf32>
    %31 = vector.shape_cast %30 : vector<8xf32> to vector<8x1xf32>
    %cst_17 = arith.constant 1.280000e+02 : f32
    %32 = vector.broadcast %cst_17 : f32 to vector<8x1xf32>
    %33 = arith.divf %31, %32 : vector<8x1xf32>
    %34 = vector.broadcast %33 : vector<8x1xf32> to vector<8x128xf32>
    %35 = arith.subf %29, %34 : vector<8x128xf32>
    %36 = arith.mulf %35, %35 : vector<8x128xf32>
    %cst_18 = arith.constant dense<0.000000e+00> : vector<8xf32>
    %37 = vector.multi_reduction <add>, %36, %cst_18 [1] : vector<8x128xf32> to vector<8xf32>
    %38 = vector.shape_cast %37 : vector<8xf32> to vector<8x1xf32>
    %cst_19 = arith.constant 1.280000e+02 : f32
    %39 = vector.broadcast %cst_19 : f32 to vector<8x1xf32>
    %40 = arith.divf %38, %39 : vector<8x1xf32>
    %cst_20 = arith.constant 9.99999997E-7 : f32
    %41 = vector.broadcast %cst_20 : f32 to vector<8x1xf32>
    %42 = arith.addf %40, %41 : vector<8x1xf32>
    %43 = math.rsqrt %42 : vector<8x1xf32>
    %44 = vector.broadcast %43 : vector<8x1xf32> to vector<8x128xf32>
    %45 = arith.mulf %35, %44 : vector<8x128xf32>
    %46 = vector.broadcast %0 : vector<1x128xf32> to vector<8x128xf32>
    %47 = arith.mulf %45, %46 : vector<8x128xf32>
    %48 = vector.broadcast %1 : vector<1x128xf32> to vector<8x128xf32>
    %49 = arith.addf %47, %48 : vector<8x128xf32>
    %50 = vector.extract_strided_slice %28 {offsets = [0, 0], sizes = [8, 128], strides = [1, 1]} : vector<8x256xf32> to vector<8x128xf32>
    %51 = vector.extract_strided_slice %28 {offsets = [0, 128], sizes = [8, 128], strides = [1, 1]} : vector<8x256xf32> to vector<8x128xf32>
    %52 = arith.mulf %50, %49 : vector<8x128xf32>
    %53 = arith.addf %52, %51 : vector<8x128xf32>
    %54 = arith.truncf %53 : vector<8x128xf32> to vector<8x128xbf16>
    %c0_21 = arith.constant 0 : index
    %c0_22 = arith.constant 0 : index
    %55 = vector.load %arg7[%c0_21, %c0_22] : memref<128x128xbf16, #tpu.memory_space<vmem>>, vector<128x128xbf16>
    %cst_23 = arith.constant dense<0.000000e+00> : vector<8x128xf32>
    %56 = tpu.matmul %54, %55, %cst_23 {dimension_numbers = #tpu.dot_dimension_numbers<[1], [0], [0], [1], [0, 0, 1, 1], [], []>} : vector<8x128xbf16>, vector<128x128xbf16>, vector<8x128xf32> -> vector<8x128xf32>
    %c0_24 = arith.constant 0 : index
    %c0_25 = arith.constant 0 : index
    %57 = vector.load %arg8[%c0_24, %c0_25] : memref<1x128xf32, #tpu.memory_space<vmem>>, vector<1x128xf32>
    %58 = vector.broadcast %57 : vector<1x128xf32> to vector<8x128xf32>
    %59 = arith.addf %56, %58 : vector<8x128xf32>
    %c0_26 = arith.constant 0 : index
    %c0_27 = arith.constant 0 : index
    %60 = vector.load %arg9[%c0_26, %c0_27] : memref<8x128xf32, #tpu.memory_space<vmem>>, vector<8x128xf32>
    tpu.vector_store %arg9[%c0_26, %c0_27], %59 {strides = array<i32>} : memref<8x128xf32, #tpu.memory_space<vmem>>, vector<8x128xf32>,
    return
  }
  func.func @transform_0(%arg0: i32) -> (i32, i32) {
    %c0_i32 = arith.constant 0 : i32
    %c0_i32_0 = arith.constant 0 : i32
    return %arg0, %c0_i32 : i32, i32
  }
  func.func @transform_1(%arg0: i32) -> (i32, i32) {
    %c0_i32 = arith.constant 0 : i32
    %c0_i32_0 = arith.constant 0 : i32
    return %arg0, %c0_i32 : i32, i32
  }
  func.func @transform_2(%arg0: i32) -> (i32, i32) {
    %c0_i32 = arith.constant 0 : i32
    %c0_i32_0 = arith.constant 0 : i32
    %c0_i32_1 = arith.constant 0 : i32
    return %c0_i32, %c0_i32_0 : i32, i32
  }
  func.func @transform_3(%arg0: i32) -> (i32, i32) {
    %c0_i32 = arith.constant 0 : i32
    %c0_i32_0 = arith.constant 0 : i32
    %c0_i32_1 = arith.constant 0 : i32
    return %c0_i32, %c0_i32_0 : i32, i32
  }
  func.func @transform_4(%arg0: i32) -> (i32, i32) {
    %c0_i32 = arith.constant 0 : i32
    %c0_i32_0 = arith.constant 0 : i32
    %c0_i32_1 = arith.constant 0 : i32
    return %c0_i32, %c0_i32_0 : i32, i32
  }
  func.func @transform_5(%arg0: i32) -> (i32, i32) {
    %c0_i32 = arith.constant 0 : i32
    %c0_i32_0 = arith.constant 0 : i32
    %c0_i32_1 = arith.constant 0 : i32
    return %c0_i32, %c0_i32_0 : i32, i32
  }
  func.func @transform_6(%arg0: i32) -> (i32, i32) {
    %c0_i32 = arith.constant 0 : i32
    %c0_i32_0 = arith.constant 0 : i32
    %c0_i32_1 = arith.constant 0 : i32
    return %c0_i32, %c0_i32_0 : i32, i32
  }
  func.func @transform_7(%arg0: i32) -> (i32, i32) {
    %c0_i32 = arith.constant 0 : i32
    %c0_i32_0 = arith.constant 0 : i32
    %c0_i32_1 = arith.constant 0 : i32
    return %c0_i32, %c0_i32_0 : i32, i32
  }
  func.func @transform_8(%arg0: i32) -> (i32, i32) {
    %c0_i32 = arith.constant 0 : i32
    %c0_i32_0 = arith.constant 0 : i32
    return %arg0, %c0_i32 : i32, i32
  }
}

module attributes {stable_mosaic.version = 11 : i64} {
  func.func @_film_kernel(%arg0: i32, %arg1: memref<8x128xf32, #tpu.memory_space<vmem>>, %arg2: memref<8x128xf32, #tpu.memory_space<vmem>>, %arg3: memref<1x128xf32, #tpu.memory_space<vmem>>, %arg4: memref<1x128xf32, #tpu.memory_space<vmem>>, %arg5: memref<128x256xbf16, #tpu.memory_space<vmem>>, %arg6: memref<1x256xf32, #tpu.memory_space<vmem>>, %arg7: memref<128x128xbf16, #tpu.memory_space<vmem>>, %arg8: memref<1x128xf32, #tpu.memory_space<vmem>>, %arg9: memref<8x128xf32, #tpu.memory_space<vmem>>) attributes {dimension_semantics = [#tpu.dimension_semantics<parallel>], iteration_bounds = array<i64: 2>, scalar_prefetch = 0 : i64, scratch_operands = 0 : i64, tpu.core_type = #tpu.core_type<tc>, window_params = [{transform_indices = @transform_0, window_bounds = array<i64: 8, 128>}, {transform_indices = @transform_1, window_bounds = array<i64: 8, 128>}, {pipeline_mode = #tpu.pipeline_mode<synchronous>, transform_indices = @transform_2, window_bounds = array<i64: 1, 128>}, {pipeline_mode = #tpu.pipeline_mode<synchronous>, transform_indices = @transform_3, window_bounds = array<i64: 1, 128>}, {pipeline_mode = #tpu.pipeline_mode<synchronous>, transform_indices = @transform_4, window_bounds = array<i64: 128, 256>}, {pipeline_mode = #tpu.pipeline_mode<synchronous>, transform_indices = @transform_5, window_bounds = array<i64: 1, 256>}, {pipeline_mode = #tpu.pipeline_mode<synchronous>, transform_indices = @transform_6, window_bounds = array<i64: 128, 128>}, {pipeline_mode = #tpu.pipeline_mode<synchronous>, transform_indices = @transform_7, window_bounds = array<i64: 1, 128>}, {transform_indices = @transform_8, window_bounds = array<i64: 8, 128>}]} {
    %c0 = arith.constant 0 : index
    %c0_0 = arith.constant 0 : index
    %0 = vector.load %arg3[%c0, %c0_0] : memref<1x128xf32, #tpu.memory_space<vmem>>, vector<1x128xf32>
    %c0_1 = arith.constant 0 : index
    %c0_2 = arith.constant 0 : index
    %1 = vector.load %arg4[%c0_1, %c0_2] : memref<1x128xf32, #tpu.memory_space<vmem>>, vector<1x128xf32>
    %c0_3 = arith.constant 0 : index
    %c0_4 = arith.constant 0 : index
    %2 = vector.load %arg1[%c0_3, %c0_4] : memref<8x128xf32, #tpu.memory_space<vmem>>, vector<8x128xf32>
    %cst = arith.constant dense<0.000000e+00> : vector<8xf32>
    %3 = vector.multi_reduction <add>, %2, %cst [1] : vector<8x128xf32> to vector<8xf32>
    %4 = vector.shape_cast %3 : vector<8xf32> to vector<8x1xf32>
    %cst_5 = arith.constant 1.280000e+02 : f32
    %5 = vector.broadcast %cst_5 : f32 to vector<8x1xf32>
    %6 = arith.divf %4, %5 : vector<8x1xf32>
    %7 = vector.broadcast %6 : vector<8x1xf32> to vector<8x128xf32>
    %8 = arith.subf %2, %7 : vector<8x128xf32>
    %9 = arith.mulf %8, %8 : vector<8x128xf32>
    %cst_6 = arith.constant dense<0.000000e+00> : vector<8xf32>
    %10 = vector.multi_reduction <add>, %9, %cst_6 [1] : vector<8x128xf32> to vector<8xf32>
    %11 = vector.shape_cast %10 : vector<8xf32> to vector<8x1xf32>
    %cst_7 = arith.constant 1.280000e+02 : f32
    %12 = vector.broadcast %cst_7 : f32 to vector<8x1xf32>
    %13 = arith.divf %11, %12 : vector<8x1xf32>
    %cst_8 = arith.constant 9.99999997E-7 : f32
    %14 = vector.broadcast %cst_8 : f32 to vector<8x1xf32>
    %15 = arith.addf %13, %14 : vector<8x1xf32>
    %16 = math.rsqrt %15 : vector<8x1xf32>
    %17 = vector.broadcast %16 : vector<8x1xf32> to vector<8x128xf32>
    %18 = arith.mulf %8, %17 : vector<8x128xf32>
    %19 = vector.broadcast %0 : vector<1x128xf32> to vector<8x128xf32>
    %20 = arith.mulf %18, %19 : vector<8x128xf32>
    %21 = vector.broadcast %1 : vector<1x128xf32> to vector<8x128xf32>
    %22 = arith.addf %20, %21 : vector<8x128xf32>
    %23 = arith.truncf %22 : vector<8x128xf32> to vector<8x128xbf16>
    %c0_9 = arith.constant 0 : index
    %c0_10 = arith.constant 0 : index
    %24 = vector.load %arg5[%c0_9, %c0_10] : memref<128x256xbf16, #tpu.memory_space<vmem>>, vector<128x256xbf16>
    %cst_11 = arith.constant dense<0.000000e+00> : vector<8x256xf32>
    %25 = tpu.matmul %23, %24, %cst_11 {dimension_numbers = #tpu.dot_dimension_numbers<[1], [0], [0], [1], [0, 0, 1, 1], [], []>} : vector<8x128xbf16>, vector<128x256xbf16>, vector<8x256xf32> -> vector<8x256xf32>
    %c0_12 = arith.constant 0 : index
    %c0_13 = arith.constant 0 : index
    %26 = vector.load %arg6[%c0_12, %c0_13] : memref<1x256xf32, #tpu.memory_space<vmem>>, vector<1x256xf32>
    %27 = vector.broadcast %26 : vector<1x256xf32> to vector<8x256xf32>
    %28 = arith.addf %25, %27 : vector<8x256xf32>
    %c0_14 = arith.constant 0 : index
    %c0_15 = arith.constant 0 : index
    %29 = vector.load %arg2[%c0_14, %c0_15] : memref<8x128xf32, #tpu.memory_space<vmem>>, vector<8x128xf32>
    %cst_16 = arith.constant dense<0.000000e+00> : vector<8xf32>
    %30 = vector.multi_reduction <add>, %29, %cst_16 [1] : vector<8x128xf32> to vector<8xf32>
    %31 = vector.shape_cast %30 : vector<8xf32> to vector<8x1xf32>
    %cst_17 = arith.constant 1.280000e+02 : f32
    %32 = vector.broadcast %cst_17 : f32 to vector<8x1xf32>
    %33 = arith.divf %31, %32 : vector<8x1xf32>
    %34 = vector.broadcast %33 : vector<8x1xf32> to vector<8x128xf32>
    %35 = arith.subf %29, %34 : vector<8x128xf32>
    %36 = arith.mulf %35, %35 : vector<8x128xf32>
    %cst_18 = arith.constant dense<0.000000e+00> : vector<8xf32>
    %37 = vector.multi_reduction <add>, %36, %cst_18 [1] : vector<8x128xf32> to vector<8xf32>
    %38 = vector.shape_cast %37 : vector<8xf32> to vector<8x1xf32>
    %cst_19 = arith.constant 1.280000e+02 : f32
    %39 = vector.broadcast %cst_19 : f32 to vector<8x1xf32>
    %40 = arith.divf %38, %39 : vector<8x1xf32>
    %cst_20 = arith.constant 9.99999997E-7 : f32
    %41 = vector.broadcast %cst_20 : f32 to vector<8x1xf32>
    %42 = arith.addf %40, %41 : vector<8x1xf32>
    %43 = math.rsqrt %42 : vector<8x1xf32>
    %44 = vector.broadcast %43 : vector<8x1xf32> to vector<8x128xf32>
    %45 = arith.mulf %35, %44 : vector<8x128xf32>
    %46 = vector.broadcast %0 : vector<1x128xf32> to vector<8x128xf32>
    %47 = arith.mulf %45, %46 : vector<8x128xf32>
    %48 = vector.broadcast %1 : vector<1x128xf32> to vector<8x128xf32>
    %49 = arith.addf %47, %48 : vector<8x128xf32>
    %50 = vector.extract_strided_slice %28 {offsets = [0, 0], sizes = [8, 128], strides = [1, 1]} : vector<8x256xf32> to vector<8x128xf32>
    %51 = vector.extract_strided_slice %28 {offsets = [0, 128], sizes = [8, 128], strides = [1, 1]} : vector<8x256xf32> to vector<8x128xf32>
    %52 = arith.mulf %50, %49 : vector<8x128xf32>
    %53 = arith.addf %52, %51 : vector<8x128xf32>
    %54 = arith.truncf %53 : vector<8x128xf32> to vector<8x128xbf16>
    %c0_21 = arith.constant 0 : index
    %c0_22 = arith.constant 0 : index
    %55 = vector.load %arg7[%c0_21, %c0_22] : memref<128x128xbf16, #tpu.memory_space<vmem>>, vector<128x128xbf16>
    %cst_23 = arith.constant dense<0.000000e+00> : vector<8x128xf32>
    %56 = tpu.matmul %54, %55, %cst_23 {dimension_numbers = #tpu.dot_dimension_numbers<[1], [0], [0], [1], [0, 0, 1, 1], [], []>} : vector<8x128xbf16>, vector<128x128xbf16>, vector<8x128xf32> -> vector<8x128xf32>
    %c0_24 = arith.constant 0 : index
    %c0_25 = arith.constant 0 : index
    %57 = vector.load %arg8[%c0_24, %c0_25] : memref<1x128xf32, #tpu.memory_space<vmem>>, vector<1x128xf32>
    %58 = vector.broadcast %57 : vector<1x128xf32> to vector<8x128xf32>
    %59 = arith.addf %56, %58 : vector<8x128xf32>
    %c0_26 = arith.constant 0 : index
    %c0_27 = arith.constant 0 : index
    %60 = vector.load %arg9[%c0_26, %c0_27] : memref<8x128xf32, #tpu.memory_space<vmem>>, vector<8x128xf32>
    tpu.vector_store %arg9[%c0_26, %c0_27], %59 {strides = array<i32>} : memref<8x128xf32, #tpu.memory_space<vmem>>, vector<8x128xf32>,
    return
  }
  func.func @transform_0(%arg0: i32) -> (i32, i32) {
    %c0_i32 = arith.constant 0 : i32
    %c0_i32_0 = arith.constant 0 : i32
    return %arg0, %c0_i32 : i32, i32
  }
  func.func @transform_1(%arg0: i32) -> (i32, i32) {
    %c0_i32 = arith.constant 0 : i32
    %c0_i32_0 = arith.constant 0 : i32
    return %arg0, %c0_i32 : i32, i32
  }
  func.func @transform_2(%arg0: i32) -> (i32, i32) {
    %c0_i32 = arith.constant 0 : i32
    %c0_i32_0 = arith.constant 0 : i32
    %c0_i32_1 = arith.constant 0 : i32
    return %c0_i32, %c0_i32_0 : i32, i32
  }
  func.func @transform_3(%arg0: i32) -> (i32, i32) {
    %c0_i32 = arith.constant 0 : i32
    %c0_i32_0 = arith.constant 0 : i32
    %c0_i32_1 = arith.constant 0 : i32
    return %c0_i32, %c0_i32_0 : i32, i32
  }
  func.func @transform_4(%arg0: i32) -> (i32, i32) {
    %c0_i32 = arith.constant 0 : i32
    %c0_i32_0 = arith.constant 0 : i32
    %c0_i32_1 = arith.constant 0 : i32
    return %c0_i32, %c0_i32_0 : i32, i32
  }
  func.func @transform_5(%arg0: i32) -> (i32, i32) {
    %c0_i32 = arith.constant 0 : i32
    %c0_i32_0 = arith.constant 0 : i32
    %c0_i32_1 = arith.constant 0 : i32
    return %c0_i32, %c0_i32_0 : i32, i32
  }
  func.func @transform_6(%arg0: i32) -> (i32, i32) {
    %c0_i32 = arith.constant 0 : i32
    %c0_i32_0 = arith.constant 0 : i32
    %c0_i32_1 = arith.constant 0 : i32
    return %c0_i32, %c0_i32_0 : i32, i32
  }
  func.func @transform_7(%arg0: i32) -> (i32, i32) {
    %c0_i32 = arith.constant 0 : i32
    %c0_i32_0 = arith.constant 0 : i32
    %c0_i32_1 = arith.constant 0 : i32
    return %c0_i32, %c0_i32_0 : i32, i32
  }
  func.func @transform_8(%arg0: i32) -> (i32, i32) {
    %c0_i32 = arith.constant 0 : i32
    %c0_i32_0 = arith.constant 0 : i32
    return %arg0, %c0_i32 : i32, i32
  }
}

</mosaic_0001>

<bundles_post_ra>
// kernel: tpu_custom_call.1
= control target key start
LH: loop header
LB: loop body
LE: loop exit
PB: predicated region body
PF: predicated region fallthrough
CT: control target
= control target key end

     0   :  { %s1554_s0 = inlined_call_operand.hbm [shape: f32[16,128], index: 0, kind: input, shape index: {}]   ;;  %s1555_s1 = inlined_call_operand.hbm [shape: f32[16,128], index: 1, kind: input, shape index: {}]   ;;  %s1556_s2 = inlined_call_operand.vmem [shape: f32[1,128], index: 2, kind: input, shape index: {}]   ;;  %s1557_s3 = inlined_call_operand.hbm [shape: f32[1,128], index: 3, kind: input, shape index: {}]   ;;  %s1558_s4 = inlined_call_operand.hbm [shape: bf16[128,256], index: 4, kind: input, shape index: {}]   ;;  %s1559_s5 = inlined_call_operand.vmem [shape: f32[1,256], index: 5, kind: input, shape index: {}]   ;;  %s1560_s6 = inlined_call_operand.hbm [shape: bf16[128,128], index: 6, kind: input, shape index: {}]   ;;  %s1561_s7 = inlined_call_operand.vmem [shape: f32[1,128], index: 7, kind: input, shape index: {}]   ;;  %s1562_s8 = inlined_call_operand.hbm [shape: f32[16,128], index: 8, kind: output, shape index: {}]  }
   0x1   :  { %1567 = sst [smem:[#allocation21_spill]] %s1557_s3 }
   0x2   :  { %1568 = sst [smem:[#allocation22_spill]] %s1558_s4 }
   0x3   :  { %1569 = sst [smem:[#allocation23_spill]] %s1560_s6 }
   0x4   :  { %13 = vsyncpa [#allocation3], 0 }
   0x5   :  { %15 = vsyncpa [#allocation3 + $0x1], 0 }
   0x6   :  { %16 = vsyncpa [#allocation6], 0 }
   0x7   :  { %18 = vsyncpa [#allocation6 + $0x1], 0 }
   0x8   :  { %19 = vsyncpa [#allocation9], 0 }
   0x9   :  { %20 = vsyncpa [#allocation4], 0 }
   0xa   :  { %22 = vsyncpa [#allocation4 + $0x1], 0  ;;  %s1341_s27 = smov 0   ;;  %s1343_s28 = smov 0  }
   0xb   :  { %s1345_s29 = smov 0   ;;  %s1347_s30 = smov 0  }
   0xc LB: > { %1570 = sst [smem:[#allocation17_spill]] %s1282_s29  ;;  %s1362_s9 = sadd.s32 4294967295, %s1286_s30   ;;  %s1286_s30 = sphi %s1347_s30, %s1585_s30   ;;  %s1282_s29 = sphi %s1345_s29, %s1587_s29   ;;  %s1278_s28 = sphi %s1343_s28, %s1589_s28   ;;  %s1274_s27 = sphi %s1341_s27, %s1588_s27  }
   0xd   : > { %1571 = sst [smem:[#allocation18_spill]] %s1286_s30  ;;  %s821_s10 = sadd.s32 4294967294, %s1286_s30  }
   0xe   : > { %p48_p0 = scmp.ne.s32.totalorder %s1278_s28, %s1274_s27  ;;  %p49_p1 = scmp.eq.s32.totalorder %s1362_s9, 0 }
   0xf   : > { %p224_p2 = scmp.eq.s32.totalorder %s1362_s9, 1  ;;  %p230_p3 = scmp.eq.s32.totalorder %s821_s10, 1 }
  0x10   : > { %p1371_p4 = por %p49_p1, %p48_p0  ;;  %p822_p5 = scmp.ge.s32.totalorder %s1286_s30, 1 }
  0x11   : > { %p1376_p6 = por %p230_p3, %p48_p0  ;;  %p237_p7 = scmp.lt.s32.totalorder %s1286_s30, 3 }
  0x12   : > { %s1574_s3 = sld [smem:[#allocation21_spill]]  ;;  %s1288_s17 = smov [#allocation7]  }
  0x13   : > { %p1384_p8 = pnand %p822_p5, %p237_p7  ;;  %s254_s18 = sshll.u32 %s1288_s17, 4  ;;  %s255_s18 = int_to_ptr.vmem [resolvable:$true] %s254_s18 }
  0x14   : > { %s1576_s4 = sld [smem:[#allocation22_spill]]  ;;  %s1289_s23 = smov [#allocation8]  }
  0x15   : > { %p980_p10 = pneg %p1384_p8  ;;  %s265_s24 = sshll.u32 %s1289_s23, 4  ;;  %s266_s24 = int_to_ptr.vmem [resolvable:$true] %s265_s24 }
  0x16   : > { %s1290_s25 = smov 128   ;;  %s1291_s26 = smov 8  }
  0x17   : > { %p1396_p11 = pnand %p980_p10, %p49_p1  ;;  %s1578_s6 = sld [smem:[#allocation23_spill]] }
  0x18   : > { %s252_s15 = sshll.u32 %s1574_s3, 4  ;;  %s1292_s17 = smov [#allocation10]   ;;  %s253_s15 = int_to_ptr.hbm [resolvable:$true] %s252_s15 }
  0x19   : > { %983 = dma.hbm_to_vmem [thread:$0]  (!%p1396_p11), %s253_s15, 16, %s255_s18, [#allocation6]  }
  0x1a   : > { %s263_s21 = sshll.u32 %s1576_s4, 4  ;;  %s282_s19 = sshll.u32 %s1292_s17, 4  ;;  %s264_s21 = int_to_ptr.hbm [resolvable:$true] %s263_s21  ;;  %s283_s19 = int_to_ptr.vmem [resolvable:$true] %s282_s19 }
  0x1b   : > { %986 = dma.hbm_to_vmem [thread:$0]  (!%p1396_p11), %s264_s21, 2048, %s266_s24, [#allocation9], %s1290_s25, %s1290_s25, %s1291_s26  }
  0x1c   : > { %s1293_s15 = smov 64   ;;  %s1294_s18 = smov 4  }
  0x1d   : > { %s280_s14 = sshll.u32 %s1578_s6, 4  ;;  %s1410_s20 = sadd.s32 1, %s1286_s30   ;;  %s281_s14 = int_to_ptr.hbm [resolvable:$true] %s280_s14 }
  0x1e   : > { %989 = dma.hbm_to_vmem [thread:$0]  (!%p1396_p11), %s281_s14, 1024, %s283_s19, [#allocation9], %s1293_s15, %s1293_s15, %s1294_s18  }
  0x1f   : > { %1579 = sst [smem:[#allocation19_spill]] %s1410_s20  ;;  %s32_s21 = ssub.s32 %s1286_s30, %s1410_s20 }
  0x20   : > { %s35_s23 = sadd.s32 1, %s1282_s29  ;;  %p33_p12 = scmp.eq.s32.totalorder %s32_s21, 0 }
  0x21   : > { %p42_p13 = scmp.ne.s32.totalorder %s1282_s29, %s1278_s28  ;;  %p43_p0 = scmp.eq.s32.totalorder %s1286_s30, 0 }
  0x22   : > { %p1004_p3 = scmp.lt.s32.totalorder %s1286_s30, 2  ;;  %s299_s22 = sand.u32 1, %s1282_s29  }
  0x23   : > { %s1420_s24 = scalar_select %p33_p12, %s1282_s29, %s35_s23  }
  0x24   : > { %p44_p5 = por %p43_p0, %p42_p13  ;;  %p1424_p7 = por %p224_p2, %p42_p13 }
  0x25   : > { %1580 = sst [smem:[#allocation20_spill]] %s1420_s24  ;;  %s828_s26 = sshll.u32 %s1286_s30, 3 }
  0x26   : > { %s827_s10 = sshll.u32 %s299_s22, 3  ;;  %s307_s17 = scalar_lea.hbm %s1554_s0, %s828_s26 }
  0x27   : > { %s309_s19 = sshll.u32 %s307_s17, 4  ;;  %s303_s15 = scalar_lea.vmem [#allocation2], %s827_s10  ;;  %s310_s19 = int_to_ptr.hbm [resolvable:$true] %s309_s19 }
  0x28   : > { %s311_s18 = sshll.u32 %s303_s15, 4  ;;  %p1435_p10 = pnand %p1004_p3, %p44_p5  ;;  %s312_s18 = int_to_ptr.vmem [resolvable:$true] %s311_s18 }
  0x29   : > { %s326_s4 = scalar_lea.hbm %s1555_s1, %s828_s26  ;;  %s318_s6 = sand.u32 1, %s1286_s30  }
  0x2a   : > { %s300_s24 = scalar_lea.sflag [#allocation3], %s299_s22  ;;  %s1148_s13 = sshra.s32 %s310_s19, 4  ;;  %s1149_s13 = int_to_ptr.hbm [resolvable:$true] %s1148_s13 }
  0x2b   : > { %s1150_s14 = scalar_lea.hbm %s1149_s13, 8  ;;  %p1152_p11 = pneg %p1435_p10 }
  0x2c   : > { %p1151_p2 = scmp.ne.s32.totalorder %s1149_s13, %s1150_s14  ;;  %s1155_s29 = scalar_lea.hbm %s1554_s0, 16 }
  0x2d   : > { %p1156_p0 = scmp.lt.s32.totalorder %s1149_s13, %s1554_s0  ;;  %p1157_p3 = scmp.lt.s32.totalorder %s1155_s29, %s1150_s14 }
  0x2e   : > { %p1153_p12 = pnand %p1152_p11, %p1151_p2 }
  0x2f   : > { %p1158_p5 = por %p1157_p3, %p1156_p0 }
  0x30   : > { %p1154_p13 = pneg %p1153_p12 }
  0x32   : > { %p1159_p9 = pnand %p1158_p5, %p1154_p13 }
  0x34   : > { %1162 = shalt.err (!%p1159_p9)
}
  0x35   : > { %993 = dma.hbm_to_vmem [thread:$0]  (!%p1435_p10), %s310_s19, 128, %s312_s18, %s300_s24  }
  0x36   : > { %s328_s22 = sshll.u32 %s326_s4, 4  ;;  %s322_s26 = scalar_lea.vmem [#allocation5], %s827_s10  ;;  %s329_s22 = int_to_ptr.hbm [resolvable:$true] %s328_s22 }
  0x37   : > { %s330_s20 = sshll.u32 %s322_s26, 4  ;;  %s319_s30 = scalar_lea.sflag [#allocation6], %s318_s6  ;;  %s331_s20 = int_to_ptr.vmem [resolvable:$true] %s330_s20 }
  0x38   : > { %s1178_s17 = sshra.s32 %s329_s22, 4  ;;  %s1185_s14 = scalar_lea.hbm %s1555_s1, 16  ;;  %s1179_s17 = int_to_ptr.hbm [resolvable:$true] %s1178_s17 }
  0x39   : > { %s1180_s15 = scalar_lea.hbm %s1179_s17, 8  ;;  %p1186_p9 = scmp.lt.s32.totalorder %s1179_s17, %s1555_s1 }
  0x3a   : > { %p1181_p2 = scmp.ne.s32.totalorder %s1179_s17, %s1180_s15  ;;  %p1187_p13 = scmp.lt.s32.totalorder %s1185_s14, %s1180_s15 }
  0x3c   : > { %p1183_p12 = pnand %p1181_p2, %p1152_p11  ;;  %p1188_p3 = por %p1187_p13, %p1186_p9 }
  0x3e   : > { %p1184_p0 = pneg %p1183_p12 }
  0x40   : > { %p1189_p5 = pnand %p1188_p3, %p1184_p0 }
  0x42   : > { %1192 = shalt.err (!%p1189_p5)
}
  0x43   : > { %996 = dma.hbm_to_vmem [thread:$0]  (!%p1435_p10), %s329_s22, 128, %s331_s20, %s319_s30  }
  0x44   : > { %339 = sbr.rel (%p1384_p8) target bundleno = 625 (0x271), region = 52  ;;  %s1470_s4 = sand.u32 (!%p1384_p8), 1, %s1278_s28  }
  0x45   : > { %s1473_s6 = sshll.u32 (!%p1384_p8), %s1470_s4, 3  ;;  %s342_s10 = scalar_lea.sflag (!%p1384_p8), [#allocation3], %s1470_s4 }
  0x46   : > { %s345_s19 = scalar_lea.vmem (!%p1384_p8), [#allocation2], %s1473_s6 }
  0x49   : > { %1253 = dma.done.wait (%p1371_p4), %s342_s10, 128  }
  0x4a   : > { %1255 = vsyncadd (%p1371_p4), %s342_s10, 4294967168  ;;  %s351_s30 = sand.u32 1, %s1362_s9   ;;  %s355_s20 = scalar_lea.vmem [#allocation5], %s1473_s6 }
  0x4b   : > { %s352_s16 = scalar_lea.sflag [#allocation6], %s351_s30 }
  0x4c   : > { %1257 = dma.done.wait (%p1371_p4), %s352_s16, 128  }
  0x4d   : > { %1259 = vsyncadd (%p1371_p4), %s352_s16, 4294967168 }
  0x4e   : > { %1261 = dma.done.wait (%p49_p1), [#allocation6], 16  }
  0x4f   : > { %1263 = vsyncadd (%p49_p1), [#allocation6], 4294967280 }
  0x50   : > { %1265 = dma.done.wait (%p49_p1), [#allocation9], 3072  }
  0x51   : > { %1267 = vsyncadd (%p49_p1), [#allocation9], 4294964224  ;;  %v576_v0 = vld [vmem:[%s355_s20] sm:$0xff]  ;;  %v411_v1 = vld [vmem:[%s345_s19] sm:$0xff]  ;;  %v1295_v2 = vmov 128.0   ;;  %s935_s22 = sshll.u32 %s1362_s9, 3 }
  0x52   : > { %577 = vadd.xlane.f32.xlu1 %v576_v0  ;;  %412 = vadd.xlane.f32.xlu0 %v411_v1  ;;  %1052 = vrcp.f32 %v1295_v2  ;;  %v896_v17 = vld [vmem:[#allocation8 + $0x70] sm:$0xf]  ;;  %v953_v18 = vld [vmem:[#allocation8 + $0x74] sm:$0xf0]  ;;  %v952_v19 = vld [vmem:[#allocation8 + $0x74] sm:$0xf]  ;;  %s695_s15 = scalar_lea.hbm %s1562_s8, %s935_s22 }
  0x53   : > { %v897_v20 = vor.u32 %v953_v18, %v896_v17  ;;  %v898_v21 = vld [vmem:[#allocation8 + $0x78] sm:$0xf0]  ;;  %v888_v23 = vld [vmem:[#allocation8 + $0x60] sm:$0xf]  ;;  %v951_v24 = vld [vmem:[#allocation8 + $0x64] sm:$0xf0] }
  0x54   : > { %v901_v22 = vor.u32 %v952_v19, %v898_v21  ;;  %v950_v25 = vld [vmem:[#allocation8 + $0x64] sm:$0xf]  ;;  %v889_v26 = vor.u32 %v951_v24, %v888_v23  ;;  %v890_v27 = vld [vmem:[#allocation8 + $0x68] sm:$0xf0]  ;;  %v880_v29 = vld [vmem:[#allocation8 + $0x50] sm:$0xf] }
  0x55   : > { %550 = vmatpush.bf16.msra.mxu0 %v897_v20  ;;  %v893_v28 = vor.u32 %v950_v25, %v890_v27  ;;  %v949_v30 = vld [vmem:[#allocation8 + $0x54] sm:$0xf0]  ;;  %v948_v31 = vld [vmem:[#allocation8 + $0x54] sm:$0xf]  ;;  %v882_v33 = vld [vmem:[#allocation8 + $0x58] sm:$0xf0] }
  0x56   : > { %563 = vmatpush.bf16.msra.mxu1 %v901_v22  ;;  %v881_v32 = vor.u32 %v949_v30, %v880_v29  ;;  %v885_v34 = vor.u32 %v948_v31, %v882_v33  ;;  %v872_v35 = vld [vmem:[#allocation8 + $0x40] sm:$0xf]  ;;  %v947_v36 = vld [vmem:[#allocation8 + $0x44] sm:$0xf0]  ;;  %v946_v37 = vld [vmem:[#allocation8 + $0x44] sm:$0xf] }
  0x57   : > { %v873_v38 = vor.u32 %v947_v36, %v872_v35  ;;  %v874_v39 = vld [vmem:[#allocation8 + $0x48] sm:$0xf0]  ;;  %v864_v41 = vld [vmem:[#allocation8 + $0x30] sm:$0xf]  ;;  %v945_v42 = vld [vmem:[#allocation8 + $0x34] sm:$0xf0] }
  0x58   : > { %v1053_v3 = vpop.eup %1052  ;;  %v877_v40 = vor.u32 %v946_v37, %v874_v39  ;;  %v944_v43 = vld [vmem:[#allocation8 + $0x34] sm:$0xf]  ;;  %v865_v44 = vor.u32 %v945_v42, %v864_v41  ;;  %v866_v45 = vld [vmem:[#allocation8 + $0x38] sm:$0xf0]  ;;  %v856_v47 = vld [vmem:[#allocation8 + $0x20] sm:$0xf] }
  0x59   : > { %v415_v4 = vmul.f32 128.0, %v1053_v3  ;;  %vm419_vm0 = vweird.f32 %v1053_v3  ;;  %551 = vmatpush.bf16.msra.mxu0 %v889_v26  ;;  %v869_v46 = vor.u32 %v944_v43, %v866_v45  ;;  %v943_v48 = vld [vmem:[#allocation8 + $0x24] sm:$0xf0]  ;;  %v942_v49 = vld [vmem:[#allocation8 + $0x24] sm:$0xf]  ;;  %v957_v19 = vld [vmem:[#allocation10 + $0x18] sm:$0xff] }
  0x5a   : > { %564 = vmatpush.bf16.msra.mxu1 %v893_v28  ;;  %v857_v50 = vor.u32 %v943_v48, %v856_v47  ;;  %v858_v51 = vld [vmem:[#allocation8 + $0x28] sm:$0xf0]  ;;  %v848_v53 = vld [vmem:[#allocation8 + $0x10] sm:$0xf]  ;;  %v941_v54 = vld [vmem:[#allocation8 + $0x14] sm:$0xf0] }
  0x5b   : > { %v416_v5 = vsub.f32 1.0, %v415_v4  ;;  %v861_v52 = vor.u32 %v942_v49, %v858_v51  ;;  %v940_v55 = vld [vmem:[#allocation8 + $0x14] sm:$0xf]  ;;  %v849_v56 = vor.u32 %v941_v54, %v848_v53  ;;  %v850_v57 = vld [vmem:[#allocation8 + $0x18] sm:$0xf0]  ;;  %v954_v39 = vld [vmem:[#allocation10] sm:$0xff] }
  0x5c   : > { %v840_v58 = vld [vmem:[#allocation8] sm:$0xf]  ;;  %v939_v59 = vld [vmem:[#allocation8 + $0x4] sm:$0xf0]  ;;  %v853_v60 = vor.u32 %v940_v55, %v850_v57  ;;  %v938_v61 = vld [vmem:[#allocation8 + $0x4] sm:$0xf] }
  0x5d   : > { %v417_v6 = vmul.f32 %v1053_v3, %v416_v5  ;;  %552 = vmatpush.bf16.msra.mxu0 %v881_v32  ;;  %v842_v62 = vld [vmem:[#allocation8 + $0x8] sm:$0xf0]  ;;  %v841_v63 = vor.u32 %v939_v59, %v840_v58  ;;  %v956_v23 = vld [vmem:[#allocation10 + $0x10] sm:$0xff]  ;;  %v1049_v27 = vld [vmem:[%s1556_s2] ss:$0 sm:$0xff]  ;;  %s408_s14 = scalar_lea.vmem [#allocation11], %s1473_s6 }
  0x5e   : > { %565 = vmatpush.bf16.msra.mxu1 %v885_v34  ;;  %v1050_v30 = vld [vmem:[#allocation7] ss:$0 sm:$0xff]  ;;  %s697_s3 = sshll.u32 %s408_s14, 4  ;;  %s699_s24 = sshll.u32 %s695_s15, 4  ;;  %s698_s3 = int_to_ptr.vmem [resolvable:$true] %s697_s3  ;;  %s700_s24 = int_to_ptr.hbm [resolvable:$true] %s699_s24 }
  0x5f   : > { %v418_v7 = vadd.f32 %v1053_v3, %v417_v6  ;;  %v960_v6 = vld [vmem:[#allocation10 + $0x30] sm:$0xff]  ;;  %s685_s10 = scalar_lea.sflag [#allocation4], %s1470_s4  ;;  %s1222_s19 = sshra.s32 %s700_s24, 4  ;;  %s1223_s19 = int_to_ptr.hbm [resolvable:$true] %s1222_s19 }
  0x60   : > { %s1224_s9 = scalar_lea.hbm %s1223_s19, 8  ;;  %s1228_s20 = scalar_lea.hbm %s1562_s8, 16 }
  0x61   : > { %v1495_v8 = vsel %vm419_vm0, %v1053_v3, %v418_v7  ;;  %553 = vmatpush.bf16.msra.mxu0 %v873_v38  ;;  %v961_v3 = vld [vmem:[#allocation10 + $0x38] sm:$0xff]  ;;  %v955_v38 = vld [vmem:[#allocation10 + $0x8] sm:$0xff]  ;;  %p1225_p1 = scmp.ne.s32.totalorder %s1223_s19, %s1224_s9  ;;  %p1229_p10 = scmp.lt.s32.totalorder %s1223_s19, %s1562_s8 }
  0x62   : > { %566 = vmatpush.bf16.msra.mxu1 %v877_v40  ;;  %670 = vmatpush.bf16.msra.mxu2 %v961_v3  ;;  %v464_v40 = vld [vmem:[%s1559_s5] sm:$0x3]  ;;  %p1230_p11 = scmp.lt.s32.totalorder %s1228_s20, %s1224_s9 }
  0x63   : > { %v467_v41 = vperm.slane %v464_v40, 1  ;;  %p1226_p4 = pnand %p1225_p1, %p1424_p7 }
  0x64   : > { %p1231_p2 = por %p1230_p11, %p1229_p10 }
  0x65   : > { %554 = vmatpush.bf16.msra.mxu0 %v865_v44  ;;  %p1227_p8 = pneg %p1226_p4 }
  0x66   : > { %567 = vmatpush.bf16.msra.mxu1 %v869_v46  ;;  %671 = vmatpush.bf16.msra.mxu2 %v960_v6 }
  0x67   : > { %p1232_p12 = pnand %p1231_p2, %p1227_p8 }
  0x69   : > { %555 = vmatpush.bf16.msra.mxu0 %v857_v50  ;;  %v1051_v50 = vld [vmem:[%s1561_s7] ss:$0 sm:$0xff] }
  0x6a   : > { %568 = vmatpush.bf16.msra.mxu1 %v861_v52 }
  0x6d   : > { %556 = vmatpush.bf16.msra.mxu0 %v849_v56 }
  0x6e   : > { %569 = vmatpush.bf16.msra.mxu1 %v853_v60 }
  0x71   : > { %557 = vmatpush.bf16.msra.mxu0 %v841_v63 }
  0xc5   : > { %v578_v9 = vpop.xlane.xlu1 %577  ;;  %v413_v10 = vpop.xlane.xlu0 %412 }
  0xc6   : > { %v579_v11 = vmul.f32 %v578_v9, %v1495_v8  ;;  %v421_v12 = vmul.f32 %v1495_v8, %v413_v10  ;;  %v959_v10 = vld [vmem:[#allocation10 + $0x28] sm:$0xff] }
  0xc7   : > { %672 = vmatpush.bf16.msra.mxu2 %v959_v10 }
  0xc8   : > { %v1499_v13 = vsub.f32 %v576_v0, %v579_v11  ;;  %v1501_v14 = vsub.f32 %v411_v1, %v421_v12  ;;  %v845_v0 = vor.u32 %v938_v61, %v842_v62  ;;  %v958_v11 = vld [vmem:[#allocation10 + $0x20] sm:$0xff] }
  0xca   : > { %v581_v15 = vmul.f32 %v1499_v13, %v1499_v13  ;;  %v423_v16 = vmul.f32 %v1501_v14, %v1501_v14  ;;  %570 = vmatpush.bf16.msra.mxu1 %v845_v0 }
  0xcb   : > { %673 = vmatpush.bf16.msra.mxu2 %v958_v11 }
  0xcc   : > { %582 = vadd.xlane.f32.xlu1 %v581_v15  ;;  %424 = vadd.xlane.f32.xlu0 %v423_v16 }
  0xcf   : > { %674 = vmatpush.bf16.msra.mxu2 %v957_v19 }
  0xd3   : > { %675 = vmatpush.bf16.msra.mxu2 %v956_v23 }
  0xd7   : > { %676 = vmatpush.bf16.msra.mxu2 %v955_v38 }
  0xdb   : > { %677 = vmatpush.bf16.msra.mxu2 %v954_v39 }
 0x13f   : > { %v583_v1 = vpop.xlane.xlu1 %582  ;;  %v425_v2 = vpop.xlane.xlu0 %424 }
 0x140   : > { %v584_v4 = vmul.f32 %v583_v1, %v1495_v8  ;;  %v426_v5 = vmul.f32 %v425_v2, %v1495_v8 }
 0x142   : > { %v585_v7 = vadd.f32 1e-06, %v584_v4  ;;  %v427_v9 = vadd.f32 1e-06, %v426_v5 }
 0x144   : > { %1054 = vrsqrt.f32 %v585_v7  ;;  %vm592_vm1 = vweird.f32 %v585_v7  ;;  %vm434_vm5 = vweird.f32 %v427_v9 }
 0x145   : > { %1056 = vrsqrt.f32 %v427_v9 }
 0x14a   : > { %v1055_v12 = vpop.eup %1054 }
 0x14b   : > { %v1057_v15 = vpop.eup %1056  ;;  %v587_v16 = vmul.f32 %v1055_v12, %v585_v7  ;;  %vm593_vm2 = vweird.f32 %v1055_v12 }
 0x14c   : > { %v429_v17 = vmul.f32 %v1057_v15, %v427_v9  ;;  %vm594_vm3 = vmor %vm592_vm1, %vm593_vm2  ;;  %vm435_vm4 = vweird.f32 %v1057_v15 }
 0x14d   : > { %v588_v18 = vmul.f32 %v1055_v12, %v587_v16  ;;  %vm436_vm6 = vmor %vm434_vm5, %vm435_vm4 }
 0x14e   : > { %v430_v20 = vmul.f32 %v1057_v15, %v429_v17 }
 0x14f   : > { %v589_v21 = vmul.f32 0.5, %v588_v18 }
 0x150   : > { %v431_v8 = vmul.f32 0.5, %v430_v20 }
 0x151   : > { %v590_v22 = vsub.f32 1.5, %v589_v21 }
 0x152   : > { %v432_v24 = vsub.f32 1.5, %v431_v8 }
 0x153   : > { %v591_v25 = vmul.f32 %v1055_v12, %v590_v22 }
 0x154   : > { %v433_v26 = vmul.f32 %v1057_v15, %v432_v24 }
 0x155   : > { %v595_v28 = vsel %vm594_vm3, %v1055_v12, %v591_v25 }
 0x156   : > { %v437_v29 = vsel %vm436_vm6, %v1057_v15, %v433_v26  ;;  %v596_v31 = vmul.f32 %v595_v28, %v1499_v13  ;;  %v466_v13 = vperm.slane %v464_v40, 0 }
 0x157   : > { %v438_v32 = vmul.f32 %v437_v29, %v1501_v14 }
 0x158   : > { %v597_v33 = vmul.f32 %v1049_v27, %v596_v31 }
 0x159   : > { %v442_v34 = vmul.f32 %v1049_v27, %v438_v32 }
 0x15a   : > { %v598_v35 = vadd.f32 %v1050_v30, %v597_v33 }
 0x15b   : > { %v446_v36 = vadd.f32 %v1050_v30, %v442_v34 }
 0x15d   : > { %v447_v37 = vpack.c.bf16 %v446_v36, %v446_v36 }
 0x15f   : > { %558 = vmatmul.bf16.vlgmr.msra.gmra.mxu0 %v447_v37  ;;  %571 = vmatmul.bf16.vlgmr.msra.gmra.mxu1 %v447_v37 }
 0x1dc   : > { %v559_v14 = vpop.f32.mrf.mxu0  ;;  %v572_v42 = vpop.f32.mrf.mxu1 }
 0x1dd   : > { %v560_v43 = vadd.f32 %v559_v14, %v466_v13  ;;  %v573_v45 = vadd.f32 %v572_v42, %v467_v41 }
 0x1df   : > { %v599_v44 = vmul.f32 %v598_v35, %v560_v43 }
 0x1e1   : > { %v600_v46 = vadd.f32 %v599_v44, %v573_v45 }
 0x1e3   : > { %v601_v47 = vpack.c.bf16 %v600_v46, %v600_v46 }
 0x1e4   : > { %v561_v48 = vpop.f32.mrf.mxu0  ;;  %v574_v49 = vpop.f32.mrf.mxu1 }
 0x1e5   : > { %678 = vmatmul.bf16.vlgmr.msra.gmra.mxu2 %v601_v47 }
 0x268   : > { %v679_v51 = vpop.f32.mrf.mxu2 }
 0x269   : > { %v680_v52 = vadd.f32 %v1051_v50, %v679_v51 }
 0x26b   : > { %683 = vst [vmem:[%s408_s14] sm:$0xff] %v680_v52 }
 0x26c   : > { %1235 = shalt.err (!%p1232_p12)
}
 0x26d   : > { %978 = dma.vmem_to_hbm [thread:$0]  (%p1424_p7), %s698_s3, 128, %s700_s24, %s685_s10  }
 0x270   : > { %v681_v53 = vpop.f32.mrf.mxu2 }
 0x271 PF: > { %s1583_s4 = sld [smem:[#allocation18_spill]]  ;;  %s711_s18 = sand.u32 1, %s1274_s27  }
 0x272   : > { %s712_s21 = scalar_lea.sflag [#allocation4], %s711_s18 }
 0x277   : > { %p1584_p0 = scmp.ge.s32.totalorder %s1583_s4, 2 }
 0x279   : > { %p998_p9 = pnand %p1584_p0, %p1376_p6 }
 0x27b   : > { %p999_p13 = pneg %p998_p9 }
 0x27d   : > { %1269 = dma.done.wait (%p999_p13), %s712_s21, 128  }
 0x27e   : > { %1271 = vsyncadd (%p999_p13), %s712_s21, 4294967168  ;;  %s1585_s30 = sld [smem:[#allocation19_spill]]  ;;  %s1588_s27 = smov %s1278_s28 }
 0x27f   : > { %s1586_s23 = sld [smem:[#allocation17_spill]] }
 0x280   : > { %s1587_s29 = sld [smem:[#allocation20_spill]] }
 0x284   : > { %p25_p3 = scmp.ge.s32.totalorder %s1585_s30, 4  }
 0x285   : > { %s1589_s28 = smov %s1586_s23 }
 0x286   :  { %27 = sbr.rel (!%p25_p3) target bundleno = 12 (0xc), region = 122 }
 0x28b   :  { %718 = vsyncpa [#allocation3], 1 }
 0x28c   :  { %720 = vsyncpa [#allocation3 + $0x1], 1 }
 0x28d   :  { %721 = vsyncpa [#allocation6], 1 }
 0x28e   :  { %723 = vsyncpa [#allocation6 + $0x1], 1 }
 0x28f   :  { %724 = vsyncpa [#allocation9], 1 }
 0x290   :  { %725 = vsyncpa [#allocation4], 1 }
 0x291   :  { %727 = vsyncpa [#allocation4 + $0x1], 1 }

// kernel: tpu_custom_call.1
= control target key start
LH: loop header
LB: loop body
LE: loop exit
PB: predicated region body
PF: predicated region fallthrough
CT: control target
= control target key end

     0   :  { %s1554_s0 = inlined_call_operand.hbm [shape: f32[16,128], index: 0, kind: input, shape index: {}]   ;;  %s1555_s1 = inlined_call_operand.hbm [shape: f32[16,128], index: 1, kind: input, shape index: {}]   ;;  %s1556_s2 = inlined_call_operand.vmem [shape: f32[1,128], index: 2, kind: input, shape index: {}]   ;;  %s1557_s3 = inlined_call_operand.hbm [shape: f32[1,128], index: 3, kind: input, shape index: {}]   ;;  %s1558_s4 = inlined_call_operand.hbm [shape: bf16[128,256], index: 4, kind: input, shape index: {}]   ;;  %s1559_s5 = inlined_call_operand.vmem [shape: f32[1,256], index: 5, kind: input, shape index: {}]   ;;  %s1560_s6 = inlined_call_operand.hbm [shape: bf16[128,128], index: 6, kind: input, shape index: {}]   ;;  %s1561_s7 = inlined_call_operand.vmem [shape: f32[1,128], index: 7, kind: input, shape index: {}]   ;;  %s1562_s8 = inlined_call_operand.hbm [shape: f32[16,128], index: 8, kind: output, shape index: {}]  }
   0x1   :  { %1567 = sst [smem:[#allocation21_spill]] %s1557_s3 }
   0x2   :  { %1568 = sst [smem:[#allocation22_spill]] %s1558_s4 }
   0x3   :  { %1569 = sst [smem:[#allocation23_spill]] %s1560_s6 }
   0x4   :  { %13 = vsyncpa [#allocation3], 0 }
   0x5   :  { %15 = vsyncpa [#allocation3 + $0x1], 0 }
   0x6   :  { %16 = vsyncpa [#allocation6], 0 }
   0x7   :  { %18 = vsyncpa [#allocation6 + $0x1], 0 }
   0x8   :  { %19 = vsyncpa [#allocation9], 0 }
   0x9   :  { %20 = vsyncpa [#allocation4], 0 }
   0xa   :  { %22 = vsyncpa [#allocation4 + $0x1], 0  ;;  %s1341_s27 = smov 0   ;;  %s1343_s28 = smov 0  }
   0xb   :  { %s1345_s29 = smov 0   ;;  %s1347_s30 = smov 0  }
   0xc LB: > { %1570 = sst [smem:[#allocation17_spill]] %s1282_s29  ;;  %s1362_s9 = sadd.s32 4294967295, %s1286_s30   ;;  %s1286_s30 = sphi %s1347_s30, %s1585_s30   ;;  %s1282_s29 = sphi %s1345_s29, %s1587_s29   ;;  %s1278_s28 = sphi %s1343_s28, %s1589_s28   ;;  %s1274_s27 = sphi %s1341_s27, %s1588_s27  }
   0xd   : > { %1571 = sst [smem:[#allocation18_spill]] %s1286_s30  ;;  %s821_s10 = sadd.s32 4294967294, %s1286_s30  }
   0xe   : > { %p48_p0 = scmp.ne.s32.totalorder %s1278_s28, %s1274_s27  ;;  %p49_p1 = scmp.eq.s32.totalorder %s1362_s9, 0 }
   0xf   : > { %p224_p2 = scmp.eq.s32.totalorder %s1362_s9, 1  ;;  %p230_p3 = scmp.eq.s32.totalorder %s821_s10, 1 }
  0x10   : > { %p1371_p4 = por %p49_p1, %p48_p0  ;;  %p822_p5 = scmp.ge.s32.totalorder %s1286_s30, 1 }
  0x11   : > { %p1376_p6 = por %p230_p3, %p48_p0  ;;  %p237_p7 = scmp.lt.s32.totalorder %s1286_s30, 3 }
  0x12   : > { %s1574_s3 = sld [smem:[#allocation21_spill]]  ;;  %s1288_s17 = smov [#allocation7]  }
  0x13   : > { %p1384_p8 = pnand %p822_p5, %p237_p7  ;;  %s254_s18 = sshll.u32 %s1288_s17, 4  ;;  %s255_s18 = int_to_ptr.vmem [resolvable:$true] %s254_s18 }
  0x14   : > { %s1576_s4 = sld [smem:[#allocation22_spill]]  ;;  %s1289_s23 = smov [#allocation8]  }
  0x15   : > { %p980_p10 = pneg %p1384_p8  ;;  %s265_s24 = sshll.u32 %s1289_s23, 4  ;;  %s266_s24 = int_to_ptr.vmem [resolvable:$true] %s265_s24 }
  0x16   : > { %s1290_s25 = smov 128   ;;  %s1291_s26 = smov 8  }
  0x17   : > { %p1396_p11 = pnand %p980_p10, %p49_p1  ;;  %s1578_s6 = sld [smem:[#allocation23_spill]] }
  0x18   : > { %s252_s15 = sshll.u32 %s1574_s3, 4  ;;  %s1292_s17 = smov [#allocation10]   ;;  %s253_s15 = int_to_ptr.hbm [resolvable:$true] %s252_s15 }
  0x19   : > { %983 = dma.hbm_to_vmem [thread:$0]  (!%p1396_p11), %s253_s15, 16, %s255_s18, [#allocation6]  }
  0x1a   : > { %s263_s21 = sshll.u32 %s1576_s4, 4  ;;  %s282_s19 = sshll.u32 %s1292_s17, 4  ;;  %s264_s21 = int_to_ptr.hbm [resolvable:$true] %s263_s21  ;;  %s283_s19 = int_to_ptr.vmem [resolvable:$true] %s282_s19 }
  0x1b   : > { %986 = dma.hbm_to_vmem [thread:$0]  (!%p1396_p11), %s264_s21, 2048, %s266_s24, [#allocation9], %s1290_s25, %s1290_s25, %s1291_s26  }
  0x1c   : > { %s1293_s15 = smov 64   ;;  %s1294_s18 = smov 4  }
  0x1d   : > { %s280_s14 = sshll.u32 %s1578_s6, 4  ;;  %s1410_s20 = sadd.s32 1, %s1286_s30   ;;  %s281_s14 = int_to_ptr.hbm [resolvable:$true] %s280_s14 }
  0x1e   : > { %989 = dma.hbm_to_vmem [thread:$0]  (!%p1396_p11), %s281_s14, 1024, %s283_s19, [#allocation9], %s1293_s15, %s1293_s15, %s1294_s18  }
  0x1f   : > { %1579 = sst [smem:[#allocation19_spill]] %s1410_s20  ;;  %s32_s21 = ssub.s32 %s1286_s30, %s1410_s20 }
  0x20   : > { %s35_s23 = sadd.s32 1, %s1282_s29  ;;  %p33_p12 = scmp.eq.s32.totalorder %s32_s21, 0 }
  0x21   : > { %p42_p13 = scmp.ne.s32.totalorder %s1282_s29, %s1278_s28  ;;  %p43_p0 = scmp.eq.s32.totalorder %s1286_s30, 0 }
  0x22   : > { %p1004_p3 = scmp.lt.s32.totalorder %s1286_s30, 2  ;;  %s299_s22 = sand.u32 1, %s1282_s29  }
  0x23   : > { %s1420_s24 = scalar_select %p33_p12, %s1282_s29, %s35_s23  }
  0x24   : > { %p44_p5 = por %p43_p0, %p42_p13  ;;  %p1424_p7 = por %p224_p2, %p42_p13 }
  0x25   : > { %1580 = sst [smem:[#allocation20_spill]] %s1420_s24  ;;  %s828_s26 = sshll.u32 %s1286_s30, 3 }
  0x26   : > { %s827_s10 = sshll.u32 %s299_s22, 3  ;;  %s307_s17 = scalar_lea.hbm %s1554_s0, %s828_s26 }
  0x27   : > { %s309_s19 = sshll.u32 %s307_s17, 4  ;;  %s303_s15 = scalar_lea.vmem [#allocation2], %s827_s10  ;;  %s310_s19 = int_to_ptr.hbm [resolvable:$true] %s309_s19 }
  0x28   : > { %s311_s18 = sshll.u32 %s303_s15, 4  ;;  %p1435_p10 = pnand %p1004_p3, %p44_p5  ;;  %s312_s18 = int_to_ptr.vmem [resolvable:$true] %s311_s18 }
  0x29   : > { %s326_s4 = scalar_lea.hbm %s1555_s1, %s828_s26  ;;  %s318_s6 = sand.u32 1, %s1286_s30  }
  0x2a   : > { %s300_s24 = scalar_lea.sflag [#allocation3], %s299_s22  ;;  %s1148_s13 = sshra.s32 %s310_s19, 4  ;;  %s1149_s13 = int_to_ptr.hbm [resolvable:$true] %s1148_s13 }
  0x2b   : > { %s1150_s14 = scalar_lea.hbm %s1149_s13, 8  ;;  %p1152_p11 = pneg %p1435_p10 }
  0x2c   : > { %p1151_p2 = scmp.ne.s32.totalorder %s1149_s13, %s1150_s14  ;;  %s1155_s29 = scalar_lea.hbm %s1554_s0, 16 }
  0x2d   : > { %p1156_p0 = scmp.lt.s32.totalorder %s1149_s13, %s1554_s0  ;;  %p1157_p3 = scmp.lt.s32.totalorder %s1155_s29, %s1150_s14 }
  0x2e   : > { %p1153_p12 = pnand %p1152_p11, %p1151_p2 }
  0x2f   : > { %p1158_p5 = por %p1157_p3, %p1156_p0 }
  0x30   : > { %p1154_p13 = pneg %p1153_p12 }
  0x32   : > { %p1159_p9 = pnand %p1158_p5, %p1154_p13 }
  0x34   : > { %1162 = shalt.err (!%p1159_p9)
}
  0x35   : > { %993 = dma.hbm_to_vmem [thread:$0]  (!%p1435_p10), %s310_s19, 128, %s312_s18, %s300_s24  }
  0x36   : > { %s328_s22 = sshll.u32 %s326_s4, 4  ;;  %s322_s26 = scalar_lea.vmem [#allocation5], %s827_s10  ;;  %s329_s22 = int_to_ptr.hbm [resolvable:$true] %s328_s22 }
  0x37   : > { %s330_s20 = sshll.u32 %s322_s26, 4  ;;  %s319_s30 = scalar_lea.sflag [#allocation6], %s318_s6  ;;  %s331_s20 = int_to_ptr.vmem [resolvable:$true] %s330_s20 }
  0x38   : > { %s1178_s17 = sshra.s32 %s329_s22, 4  ;;  %s1185_s14 = scalar_lea.hbm %s1555_s1, 16  ;;  %s1179_s17 = int_to_ptr.hbm [resolvable:$true] %s1178_s17 }
  0x39   : > { %s1180_s15 = scalar_lea.hbm %s1179_s17, 8  ;;  %p1186_p9 = scmp.lt.s32.totalorder %s1179_s17, %s1555_s1 }
  0x3a   : > { %p1181_p2 = scmp.ne.s32.totalorder %s1179_s17, %s1180_s15  ;;  %p1187_p13 = scmp.lt.s32.totalorder %s1185_s14, %s1180_s15 }
  0x3c   : > { %p1183_p12 = pnand %p1181_p2, %p1152_p11  ;;  %p1188_p3 = por %p1187_p13, %p1186_p9 }
  0x3e   : > { %p1184_p0 = pneg %p1183_p12 }
  0x40   : > { %p1189_p5 = pnand %p1188_p3, %p1184_p0 }
  0x42   : > { %1192 = shalt.err (!%p1189_p5)
}
  0x43   : > { %996 = dma.hbm_to_vmem [thread:$0]  (!%p1435_p10), %s329_s22, 128, %s331_s20, %s319_s30  }
  0x44   : > { %339 = sbr.rel (%p1384_p8) target bundleno = 625 (0x271), region = 52  ;;  %s1470_s4 = sand.u32 (!%p1384_p8), 1, %s1278_s28  }
  0x45   : > { %s1473_s6 = sshll.u32 (!%p1384_p8), %s1470_s4, 3  ;;  %s342_s10 = scalar_lea.sflag (!%p1384_p8), [#allocation3], %s1470_s4 }
  0x46   : > { %s345_s19 = scalar_lea.vmem (!%p1384_p8), [#allocation2], %s1473_s6 }
  0x49   : > { %1253 = dma.done.wait (%p1371_p4), %s342_s10, 128  }
  0x4a   : > { %1255 = vsyncadd (%p1371_p4), %s342_s10, 4294967168  ;;  %s351_s30 = sand.u32 1, %s1362_s9   ;;  %s355_s20 = scalar_lea.vmem [#allocation5], %s1473_s6 }
  0x4b   : > { %s352_s16 = scalar_lea.sflag [#allocation6], %s351_s30 }
  0x4c   : > { %1257 = dma.done.wait (%p1371_p4), %s352_s16, 128  }
  0x4d   : > { %1259 = vsyncadd (%p1371_p4), %s352_s16, 4294967168 }
  0x4e   : > { %1261 = dma.done.wait (%p49_p1), [#allocation6], 16  }
  0x4f   : > { %1263 = vsyncadd (%p49_p1), [#allocation6], 4294967280 }
  0x50   : > { %1265 = dma.done.wait (%p49_p1), [#allocation9], 3072  }
  0x51   : > { %1267 = vsyncadd (%p49_p1), [#allocation9], 4294964224  ;;  %v576_v0 = vld [vmem:[%s355_s20] sm:$0xff]  ;;  %v411_v1 = vld [vmem:[%s345_s19] sm:$0xff]  ;;  %v1295_v2 = vmov 128.0   ;;  %s935_s22 = sshll.u32 %s1362_s9, 3 }
  0x52   : > { %577 = vadd.xlane.f32.xlu1 %v576_v0  ;;  %412 = vadd.xlane.f32.xlu0 %v411_v1  ;;  %1052 = vrcp.f32 %v1295_v2  ;;  %v896_v17 = vld [vmem:[#allocation8 + $0x70] sm:$0xf]  ;;  %v953_v18 = vld [vmem:[#allocation8 + $0x74] sm:$0xf0]  ;;  %v952_v19 = vld [vmem:[#allocation8 + $0x74] sm:$0xf]  ;;  %s695_s15 = scalar_lea.hbm %s1562_s8, %s935_s22 }
  0x53   : > { %v897_v20 = vor.u32 %v953_v18, %v896_v17  ;;  %v898_v21 = vld [vmem:[#allocation8 + $0x78] sm:$0xf0]  ;;  %v888_v23 = vld [vmem:[#allocation8 + $0x60] sm:$0xf]  ;;  %v951_v24 = vld [vmem:[#allocation8 + $0x64] sm:$0xf0] }
  0x54   : > { %v901_v22 = vor.u32 %v952_v19, %v898_v21  ;;  %v950_v25 = vld [vmem:[#allocation8 + $0x64] sm:$0xf]  ;;  %v889_v26 = vor.u32 %v951_v24, %v888_v23  ;;  %v890_v27 = vld [vmem:[#allocation8 + $0x68] sm:$0xf0]  ;;  %v880_v29 = vld [vmem:[#allocation8 + $0x50] sm:$0xf] }
  0x55   : > { %550 = vmatpush.bf16.msra.mxu0 %v897_v20  ;;  %v893_v28 = vor.u32 %v950_v25, %v890_v27  ;;  %v949_v30 = vld [vmem:[#allocation8 + $0x54] sm:$0xf0]  ;;  %v948_v31 = vld [vmem:[#allocation8 + $0x54] sm:$0xf]  ;;  %v882_v33 = vld [vmem:[#allocation8 + $0x58] sm:$0xf0] }
  0x56   : > { %563 = vmatpush.bf16.msra.mxu1 %v901_v22  ;;  %v881_v32 = vor.u32 %v949_v30, %v880_v29  ;;  %v885_v34 = vor.u32 %v948_v31, %v882_v33  ;;  %v872_v35 = vld [vmem:[#allocation8 + $0x40] sm:$0xf]  ;;  %v947_v36 = vld [vmem:[#allocation8 + $0x44] sm:$0xf0]  ;;  %v946_v37 = vld [vmem:[#allocation8 + $0x44] sm:$0xf] }
  0x57   : > { %v873_v38 = vor.u32 %v947_v36, %v872_v35  ;;  %v874_v39 = vld [vmem:[#allocation8 + $0x48] sm:$0xf0]  ;;  %v864_v41 = vld [vmem:[#allocation8 + $0x30] sm:$0xf]  ;;  %v945_v42 = vld [vmem:[#allocation8 + $0x34] sm:$0xf0] }
  0x58   : > { %v1053_v3 = vpop.eup %1052  ;;  %v877_v40 = vor.u32 %v946_v37, %v874_v39  ;;  %v944_v43 = vld [vmem:[#allocation8 + $0x34] sm:$0xf]  ;;  %v865_v44 = vor.u32 %v945_v42, %v864_v41  ;;  %v866_v45 = vld [vmem:[#allocation8 + $0x38] sm:$0xf0]  ;;  %v856_v47 = vld [vmem:[#allocation8 + $0x20] sm:$0xf] }
  0x59   : > { %v415_v4 = vmul.f32 128.0, %v1053_v3  ;;  %vm419_vm0 = vweird.f32 %v1053_v3  ;;  %551 = vmatpush.bf16.msra.mxu0 %v889_v26  ;;  %v869_v46 = vor.u32 %v944_v43, %v866_v45  ;;  %v943_v48 = vld [vmem:[#allocation8 + $0x24] sm:$0xf0]  ;;  %v942_v49 = vld [vmem:[#allocation8 + $0x24] sm:$0xf]  ;;  %v957_v19 = vld [vmem:[#allocation10 + $0x18] sm:$0xff] }
  0x5a   : > { %564 = vmatpush.bf16.msra.mxu1 %v893_v28  ;;  %v857_v50 = vor.u32 %v943_v48, %v856_v47  ;;  %v858_v51 = vld [vmem:[#allocation8 + $0x28] sm:$0xf0]  ;;  %v848_v53 = vld [vmem:[#allocation8 + $0x10] sm:$0xf]  ;;  %v941_v54 = vld [vmem:[#allocation8 + $0x14] sm:$0xf0] }
  0x5b   : > { %v416_v5 = vsub.f32 1.0, %v415_v4  ;;  %v861_v52 = vor.u32 %v942_v49, %v858_v51  ;;  %v940_v55 = vld [vmem:[#allocation8 + $0x14] sm:$0xf]  ;;  %v849_v56 = vor.u32 %v941_v54, %v848_v53  ;;  %v850_v57 = vld [vmem:[#allocation8 + $0x18] sm:$0xf0]  ;;  %v954_v39 = vld [vmem:[#allocation10] sm:$0xff] }
  0x5c   : > { %v840_v58 = vld [vmem:[#allocation8] sm:$0xf]  ;;  %v939_v59 = vld [vmem:[#allocation8 + $0x4] sm:$0xf0]  ;;  %v853_v60 = vor.u32 %v940_v55, %v850_v57  ;;  %v938_v61 = vld [vmem:[#allocation8 + $0x4] sm:$0xf] }
  0x5d   : > { %v417_v6 = vmul.f32 %v1053_v3, %v416_v5  ;;  %552 = vmatpush.bf16.msra.mxu0 %v881_v32  ;;  %v842_v62 = vld [vmem:[#allocation8 + $0x8] sm:$0xf0]  ;;  %v841_v63 = vor.u32 %v939_v59, %v840_v58  ;;  %v956_v23 = vld [vmem:[#allocation10 + $0x10] sm:$0xff]  ;;  %v1049_v27 = vld [vmem:[%s1556_s2] ss:$0 sm:$0xff]  ;;  %s408_s14 = scalar_lea.vmem [#allocation11], %s1473_s6 }
  0x5e   : > { %565 = vmatpush.bf16.msra.mxu1 %v885_v34  ;;  %v1050_v30 = vld [vmem:[#allocation7] ss:$0 sm:$0xff]  ;;  %s697_s3 = sshll.u32 %s408_s14, 4  ;;  %s699_s24 = sshll.u32 %s695_s15, 4  ;;  %s698_s3 = int_to_ptr.vmem [resolvable:$true] %s697_s3  ;;  %s700_s24 = int_to_ptr.hbm [resolvable:$true] %s699_s24 }
  0x5f   : > { %v418_v7 = vadd.f32 %v1053_v3, %v417_v6  ;;  %v960_v6 = vld [vmem:[#allocation10 + $0x30] sm:$0xff]  ;;  %s685_s10 = scalar_lea.sflag [#allocation4], %s1470_s4  ;;  %s1222_s19 = sshra.s32 %s700_s24, 4  ;;  %s1223_s19 = int_to_ptr.hbm [resolvable:$true] %s1222_s19 }
  0x60   : > { %s1224_s9 = scalar_lea.hbm %s1223_s19, 8  ;;  %s1228_s20 = scalar_lea.hbm %s1562_s8, 16 }
  0x61   : > { %v1495_v8 = vsel %vm419_vm0, %v1053_v3, %v418_v7  ;;  %553 = vmatpush.bf16.msra.mxu0 %v873_v38  ;;  %v961_v3 = vld [vmem:[#allocation10 + $0x38] sm:$0xff]  ;;  %v955_v38 = vld [vmem:[#allocation10 + $0x8] sm:$0xff]  ;;  %p1225_p1 = scmp.ne.s32.totalorder %s1223_s19, %s1224_s9  ;;  %p1229_p10 = scmp.lt.s32.totalorder %s1223_s19, %s1562_s8 }
  0x62   : > { %566 = vmatpush.bf16.msra.mxu1 %v877_v40  ;;  %670 = vmatpush.bf16.msra.mxu2 %v961_v3  ;;  %v464_v40 = vld [vmem:[%s1559_s5] sm:$0x3]  ;;  %p1230_p11 = scmp.lt.s32.totalorder %s1228_s20, %s1224_s9 }
  0x63   : > { %v467_v41 = vperm.slane %v464_v40, 1  ;;  %p1226_p4 = pnand %p1225_p1, %p1424_p7 }
  0x64   : > { %p1231_p2 = por %p1230_p11, %p1229_p10 }
  0x65   : > { %554 = vmatpush.bf16.msra.mxu0 %v865_v44  ;;  %p1227_p8 = pneg %p1226_p4 }
  0x66   : > { %567 = vmatpush.bf16.msra.mxu1 %v869_v46  ;;  %671 = vmatpush.bf16.msra.mxu2 %v960_v6 }
  0x67   : > { %p1232_p12 = pnand %p1231_p2, %p1227_p8 }
  0x69   : > { %555 = vmatpush.bf16.msra.mxu0 %v857_v50  ;;  %v1051_v50 = vld [vmem:[%s1561_s7] ss:$0 sm:$0xff] }
  0x6a   : > { %568 = vmatpush.bf16.msra.mxu1 %v861_v52 }
  0x6d   : > { %556 = vmatpush.bf16.msra.mxu0 %v849_v56 }
  0x6e   : > { %569 = vmatpush.bf16.msra.mxu1 %v853_v60 }
  0x71   : > { %557 = vmatpush.bf16.msra.mxu0 %v841_v63 }
  0xc5   : > { %v578_v9 = vpop.xlane.xlu1 %577  ;;  %v413_v10 = vpop.xlane.xlu0 %412 }
  0xc6   : > { %v579_v11 = vmul.f32 %v578_v9, %v1495_v8  ;;  %v421_v12 = vmul.f32 %v1495_v8, %v413_v10  ;;  %v959_v10 = vld [vmem:[#allocation10 + $0x28] sm:$0xff] }
  0xc7   : > { %672 = vmatpush.bf16.msra.mxu2 %v959_v10 }
  0xc8   : > { %v1499_v13 = vsub.f32 %v576_v0, %v579_v11  ;;  %v1501_v14 = vsub.f32 %v411_v1, %v421_v12  ;;  %v845_v0 = vor.u32 %v938_v61, %v842_v62  ;;  %v958_v11 = vld [vmem:[#allocation10 + $0x20] sm:$0xff] }
  0xca   : > { %v581_v15 = vmul.f32 %v1499_v13, %v1499_v13  ;;  %v423_v16 = vmul.f32 %v1501_v14, %v1501_v14  ;;  %570 = vmatpush.bf16.msra.mxu1 %v845_v0 }
  0xcb   : > { %673 = vmatpush.bf16.msra.mxu2 %v958_v11 }
  0xcc   : > { %582 = vadd.xlane.f32.xlu1 %v581_v15  ;;  %424 = vadd.xlane.f32.xlu0 %v423_v16 }
  0xcf   : > { %674 = vmatpush.bf16.msra.mxu2 %v957_v19 }
  0xd3   : > { %675 = vmatpush.bf16.msra.mxu2 %v956_v23 }
  0xd7   : > { %676 = vmatpush.bf16.msra.mxu2 %v955_v38 }
  0xdb   : > { %677 = vmatpush.bf16.msra.mxu2 %v954_v39 }
 0x13f   : > { %v583_v1 = vpop.xlane.xlu1 %582  ;;  %v425_v2 = vpop.xlane.xlu0 %424 }
 0x140   : > { %v584_v4 = vmul.f32 %v583_v1, %v1495_v8  ;;  %v426_v5 = vmul.f32 %v425_v2, %v1495_v8 }
 0x142   : > { %v585_v7 = vadd.f32 1e-06, %v584_v4  ;;  %v427_v9 = vadd.f32 1e-06, %v426_v5 }
 0x144   : > { %1054 = vrsqrt.f32 %v585_v7  ;;  %vm592_vm1 = vweird.f32 %v585_v7  ;;  %vm434_vm5 = vweird.f32 %v427_v9 }
 0x145   : > { %1056 = vrsqrt.f32 %v427_v9 }
 0x14a   : > { %v1055_v12 = vpop.eup %1054 }
 0x14b   : > { %v1057_v15 = vpop.eup %1056  ;;  %v587_v16 = vmul.f32 %v1055_v12, %v585_v7  ;;  %vm593_vm2 = vweird.f32 %v1055_v12 }
 0x14c   : > { %v429_v17 = vmul.f32 %v1057_v15, %v427_v9  ;;  %vm594_vm3 = vmor %vm592_vm1, %vm593_vm2  ;;  %vm435_vm4 = vweird.f32 %v1057_v15 }
 0x14d   : > { %v588_v18 = vmul.f32 %v1055_v12, %v587_v16  ;;  %vm436_vm6 = vmor %vm434_vm5, %vm435_vm4 }
 0x14e   : > { %v430_v20 = vmul.f32 %v1057_v15, %v429_v17 }
 0x14f   : > { %v589_v21 = vmul.f32 0.5, %v588_v18 }
 0x150   : > { %v431_v8 = vmul.f32 0.5, %v430_v20 }
 0x151   : > { %v590_v22 = vsub.f32 1.5, %v589_v21 }
 0x152   : > { %v432_v24 = vsub.f32 1.5, %v431_v8 }
 0x153   : > { %v591_v25 = vmul.f32 %v1055_v12, %v590_v22 }
 0x154   : > { %v433_v26 = vmul.f32 %v1057_v15, %v432_v24 }
 0x155   : > { %v595_v28 = vsel %vm594_vm3, %v1055_v12, %v591_v25 }
 0x156   : > { %v437_v29 = vsel %vm436_vm6, %v1057_v15, %v433_v26  ;;  %v596_v31 = vmul.f32 %v595_v28, %v1499_v13  ;;  %v466_v13 = vperm.slane %v464_v40, 0 }
 0x157   : > { %v438_v32 = vmul.f32 %v437_v29, %v1501_v14 }
 0x158   : > { %v597_v33 = vmul.f32 %v1049_v27, %v596_v31 }
 0x159   : > { %v442_v34 = vmul.f32 %v1049_v27, %v438_v32 }
 0x15a   : > { %v598_v35 = vadd.f32 %v1050_v30, %v597_v33 }
 0x15b   : > { %v446_v36 = vadd.f32 %v1050_v30, %v442_v34 }
 0x15d   : > { %v447_v37 = vpack.c.bf16 %v446_v36, %v446_v36 }
 0x15f   : > { %558 = vmatmul.bf16.vlgmr.msra.gmra.mxu0 %v447_v37  ;;  %571 = vmatmul.bf16.vlgmr.msra.gmra.mxu1 %v447_v37 }
 0x1dc   : > { %v559_v14 = vpop.f32.mrf.mxu0  ;;  %v572_v42 = vpop.f32.mrf.mxu1 }
 0x1dd   : > { %v560_v43 = vadd.f32 %v559_v14, %v466_v13  ;;  %v573_v45 = vadd.f32 %v572_v42, %v467_v41 }
 0x1df   : > { %v599_v44 = vmul.f32 %v598_v35, %v560_v43 }
 0x1e1   : > { %v600_v46 = vadd.f32 %v599_v44, %v573_v45 }
 0x1e3   : > { %v601_v47 = vpack.c.bf16 %v600_v46, %v600_v46 }
 0x1e4   : > { %v561_v48 = vpop.f32.mrf.mxu0  ;;  %v574_v49 = vpop.f32.mrf.mxu1 }
 0x1e5   : > { %678 = vmatmul.bf16.vlgmr.msra.gmra.mxu2 %v601_v47 }
 0x268   : > { %v679_v51 = vpop.f32.mrf.mxu2 }
 0x269   : > { %v680_v52 = vadd.f32 %v1051_v50, %v679_v51 }
 0x26b   : > { %683 = vst [vmem:[%s408_s14] sm:$0xff] %v680_v52 }
 0x26c   : > { %1235 = shalt.err (!%p1232_p12)
}
 0x26d   : > { %978 = dma.vmem_to_hbm [thread:$0]  (%p1424_p7), %s698_s3, 128, %s700_s24, %s685_s10  }
 0x270   : > { %v681_v53 = vpop.f32.mrf.mxu2 }
 0x271 PF: > { %s1583_s4 = sld [smem:[#allocation18_spill]]  ;;  %s711_s18 = sand.u32 1, %s1274_s27  }
 0x272   : > { %s712_s21 = scalar_lea.sflag [#allocation4], %s711_s18 }
 0x277   : > { %p1584_p0 = scmp.ge.s32.totalorder %s1583_s4, 2 }
 0x279   : > { %p998_p9 = pnand %p1584_p0, %p1376_p6 }
 0x27b   : > { %p999_p13 = pneg %p998_p9 }
 0x27d   : > { %1269 = dma.done.wait (%p999_p13), %s712_s21, 128  }
 0x27e   : > { %1271 = vsyncadd (%p999_p13), %s712_s21, 4294967168  ;;  %s1585_s30 = sld [smem:[#allocation19_spill]]  ;;  %s1588_s27 = smov %s1278_s28 }
 0x27f   : > { %s1586_s23 = sld [smem:[#allocation17_spill]] }
 0x280   : > { %s1587_s29 = sld [smem:[#allocation20_spill]] }
 0x284   : > { %p25_p3 = scmp.ge.s32.totalorder %s1585_s30, 4  }
 0x285   : > { %s1589_s28 = smov %s1586_s23 }
 0x286   :  { %27 = sbr.rel (!%p25_p3) target bundleno = 12 (0xc), region = 122 }
 0x28b   :  { %718 = vsyncpa [#allocation3], 1 }
 0x28c   :  { %720 = vsyncpa [#allocation3 + $0x1], 1 }
 0x28d   :  { %721 = vsyncpa [#allocation6], 1 }
 0x28e   :  { %723 = vsyncpa [#allocation6 + $0x1], 1 }
 0x28f   :  { %724 = vsyncpa [#allocation9], 1 }
 0x290   :  { %725 = vsyncpa [#allocation4], 1 }
 0x291   :  { %727 = vsyncpa [#allocation4 + $0x1], 1 }

</bundles_post_ra>
